<compile_context>
chip_gen: v6e
topology: v6e:2x2x1
jax: 0.10.0
libtpu: 0.0.40
codegen_flags: <defaults>
</compile_context>

<pallas_src>
import jax
import jax.numpy as jnp
import numpy as np
from jax.experimental import pallas as pl
from jax.experimental.pallas import tpu as pltpu


def _patch_embed_kernel(x_ref, w_ref, b_ref, o_ref):
    # x_ref: [bn, K, tm] bf16 patches (K = C*p*p), lane dim = spatial tile.
    # w_ref: [E, K]      bf16, resident across the whole grid.
    # b_ref: [E, 1]      f32,  resident.
    # o_ref: [bn, E, tm] output tile (lane-dense along tm).
    #
    # Padded lanes of a partial spatial tile hold undefined data; each output
    # column depends only on its own input column and out-of-bounds columns
    # are masked at the store, so this is safe as long as nothing here reduces
    # across bn or tm.
    w = w_ref[...]
    bias = b_ref[...]
    for b in range(x_ref.shape[0]):  # bn is small (<= 8) and static: unrolled
        acc = jnp.dot(w, x_ref[b], preferred_element_type=jnp.float32)
        o_ref[b] = (acc + bias).astype(o_ref.dtype)


def _select_tiling(N, HpWp, K, E, out_nbytes, *,
                   vmem_io_budget=20 * 1024 * 1024, tm_cap=16384, bn_cap=8):
    """Pick (spatial tile tm, images-per-block bn) from a VMEM I/O budget."""
    # Bytes of double-buffered input (bf16) + output held in VMEM per spatial
    # position.  K=48, E=96, f32 out -> 960 B/pos -> ~21k positions in 20 MiB.
    per_pos = 2 * (K * 2 + E * out_nbytes)
    budget_pos = max(128, vmem_io_budget // per_pos)

    if HpWp > min(budget_pos, tm_cap):
        # Large image: tile spatially with lane-dense (multiple-of-128) tiles.
        tm = max(128, (min(budget_pos, tm_cap) // 128) * 128)
        bn = 1
    else:
        # Small image: one spatial tile, pack several batch images per block
        # (bn divides N, so no partially-valid batch blocks are ever created).
        tm = HpWp
        max_bn = min(N, bn_cap, max(1, budget_pos // max(HpWp, 1)))
        if N > 1:
            # Keep at least 2 grid steps so both v7x TensorCores get work.
            max_bn = min(max_bn, max(1, N // 2))
        bn = 1
        for cand in range(max_bn, 0, -1):
            if N % cand == 0:
                bn = cand
                break
    return tm, bn


def patch_embed_forward(x, weight, bias, patch_size, *, out_dtype=None):
    """x: [N, C, H, W]; weight: [E, C, p, p]; bias: [E] -> [N, E, H//p, W//p]."""
    N, C, H, W = x.shape
    E = weight.shape[0]
    p = patch_size
    assert H % p == 0 and W % p == 0
    Hp, Wp = H // p, W // p
    HpWp = Hp * Wp
    K = C * p * p
    out_dtype = x.dtype if out_dtype is None else jnp.dtype(out_dtype)
    out_nbytes = jnp.dtype(out_dtype).itemsize

    # Patchify, already transposed so the kernel output is NCHW-contiguous:
    #   patches_t[n, c*p*p + kh*p + kw, hp*Wp + wp] = x[n, c, hp*p+kh, wp*p+kw]
    # Single XLA transpose pass; the bf16 downcast fuses into it.
    patches_t = (
        x.reshape(N, C, Hp, p, Wp, p)
        .transpose(0, 1, 3, 5, 2, 4)          # [N, C, p, p, Hp, Wp]
        .reshape(N, K, HpWp)
        .astype(jnp.bfloat16)
    )
    # Weight in PyTorch conv reduction order (C, kh, kw): [E, K] (free reshape).
    wmat = weight.reshape(E, K).astype(jnp.bfloat16)
    bias2d = bias.astype(jnp.float32).reshape(E, 1)

    tm, bn = _select_tiling(N, HpWp, K, E, out_nbytes)
    grid = ((N + bn - 1) // bn, (HpWp + tm - 1) // tm)

    cost = pl.CostEstimate(
        flops=2 * N * E * K * HpWp,
        transcendentals=0,
        bytes_accessed=(N * K * HpWp * 2          # bf16 patches in
                        + E * K * 2 + E * 4       # weight + bias
                        + N * E * HpWp * out_nbytes),
    )

    out = pl.pallas_call(
        _patch_embed_kernel,
        out_shape=jax.ShapeDtypeStruct((N, E, HpWp), out_dtype),
        grid=grid,
        in_specs=[
            pl.BlockSpec((bn, K, tm), lambda b, j: (b, 0, j)),   # patch tiles
            pl.BlockSpec((E, K), lambda b, j: (0, 0)),           # weight (resident)
            pl.BlockSpec((E, 1), lambda b, j: (0, 0)),           # bias (resident)
        ],
        out_specs=pl.BlockSpec((bn, E, tm), lambda b, j: (b, 0, j)),
        compiler_params=pltpu.CompilerParams(
            dimension_semantics=("parallel", "parallel"),
            # Explicit scoped-VMEM limit: >= the ~20 MiB of double-buffered
            # I/O tiles + resident weight/bias, and <= v7x's 64 MiB physical.
            vmem_limit_bytes=32 * 1024 * 1024,
        ),
        cost_estimate=cost,
    )(patches_t, wmat, bias2d)

    # [N, E, Hp*Wp] -> [N, E, Hp, Wp] is a free contiguous reshape: NCHW out.
    return out.reshape(N, E, Hp, Wp)


def init_params(key, in_channels, embed_dim, patch_size, scale=0.1):
    """Deterministic stand-in for init_weights_with_scale(proj, 0.1):
    variance-scaling normal init, then multiply by `scale`."""
    kw, kb = jax.random.split(key)
    fan_in = in_channels * patch_size * patch_size
    std = (2.0 / fan_in) ** 0.5
    weight = (
        jax.random.normal(kw, (embed_dim, in_channels, patch_size, patch_size),
                          dtype=jnp.float32) * std * scale
    )
    bias = jax.random.normal(kb, (embed_dim,), dtype=jnp.float32) * 0.01 * scale
    return weight, bias


def _reference(x, weight, bias, p):
    # Plain JAX strided conv (same as torch.nn.Conv2d, NCHW/OIHW, padding=0).
    return jax.lax.conv_general_dilated(
        x, weight,
        window_strides=(p, p),
        padding="VALID",
        dimension_numbers=("NCHW", "OIHW", "NCHW"),
        precision=jax.lax.Precision.HIGHEST,
    ) + bias.reshape(1, -1, 1, 1)


if __name__ == "__main__":
    key = jax.random.PRNGKey(0)
    patch_size, embed_dim = 4, 96

    # Small test cases exercising: the default demo shape, batch-packing
    # (bn > 1), and the bf16-output knob with a lane-dense (>=128) tile.
    cases = [
        # (N, C, H, W, out_dtype)
        (2, 3, 16, 16, None),           # module defaults; grid (2, 1), bn=1
        (4, 3, 32, 32, None),           # bn=2 batch packing; grid (2, 1)
        (1, 3, 64, 64, jnp.bfloat16),   # HpWp=256 lane-dense tile, bf16 out
    ]

    for idx, (n, c, h, w, od) in enumerate(cases):
        kx, kp = jax.random.split(jax.random.fold_in(key, idx))
        x = jax.random.normal(kx, (n, c, h, w), dtype=jnp.float32)
        weight, bias = init_params(kp, c, embed_dim, patch_size)

        out = patch_embed_forward(x, weight, bias, patch_size, out_dtype=od)
        out = jax.block_until_ready(out)

        ref = _reference(x, weight, bias, patch_size)
        assert out.shape == (n, embed_dim, h // patch_size, w // patch_size)
        np.testing.assert_allclose(
            np.asarray(out.astype(jnp.float32)), np.asarray(ref),
            rtol=2e-2, atol=2e-2,
        )

    print("KERNEL_OK")
</pallas_src>

<mosaic_0001>
module attributes {stable_mosaic.version = 11 : i64} {
  func.func @_patch_embed_kernel(%arg0: i32, %arg1: i32, %arg2: memref<1x48x16xbf16, #tpu.memory_space<vmem>>, %arg3: memref<96x48xbf16, #tpu.memory_space<vmem>>, %arg4: memref<96x1xf32, #tpu.memory_space<vmem>>, %arg5: memref<1x96x16xf32, #tpu.memory_space<vmem>>) attributes {dimension_semantics = [#tpu.dimension_semantics<parallel>, #tpu.dimension_semantics<parallel>], iteration_bounds = array<i64: 2, 1>, scalar_prefetch = 0 : i64, scratch_operands = 0 : i64, tpu.core_type = #tpu.core_type<tc>, window_params = [{transform_indices = @transform_0, window_bounds = array<i64: 1, 48, 16>}, {pipeline_mode = #tpu.pipeline_mode<synchronous>, transform_indices = @transform_1, window_bounds = array<i64: 96, 48>}, {pipeline_mode = #tpu.pipeline_mode<synchronous>, transform_indices = @transform_2, window_bounds = array<i64: 96, 1>}, {transform_indices = @transform_3, window_bounds = array<i64: 1, 96, 16>}]} {
    %c0 = arith.constant 0 : index
    %c0_0 = arith.constant 0 : index
    %0 = vector.load %arg3[%c0, %c0_0] : memref<96x48xbf16, #tpu.memory_space<vmem>>, vector<96x48xbf16>
    %c0_1 = arith.constant 0 : index
    %c0_2 = arith.constant 0 : index
    %1 = vector.load %arg4[%c0_1, %c0_2] : memref<96x1xf32, #tpu.memory_space<vmem>>, vector<96x1xf32>
    %c0_3 = arith.constant 0 : index
    %c0_4 = arith.constant 0 : index
    %c0_5 = arith.constant 0 : index
    %2 = vector.load %arg2[%c0_3, %c0_4, %c0_5] : memref<1x48x16xbf16, #tpu.memory_space<vmem>>, vector<1x48x16xbf16>
    %3 = vector.shape_cast %2 : vector<1x48x16xbf16> to vector<48x16xbf16>
    %cst = arith.constant dense<0.000000e+00> : vector<96x16xf32>
    %4 = tpu.matmul %0, %3, %cst {dimension_numbers = #tpu.dot_dimension_numbers<[1], [0], [0], [1], [0, 0, 1, 1], [], []>} : vector<96x48xbf16>, vector<48x16xbf16>, vector<96x16xf32> -> vector<96x16xf32>
    %5 = vector.broadcast %1 : vector<96x1xf32> to vector<96x16xf32>
    %6 = arith.addf %4, %5 : vector<96x16xf32>
    %c0_6 = arith.constant 0 : index
    %c0_7 = arith.constant 0 : index
    %c0_8 = arith.constant 0 : index
    %7 = vector.load %arg5[%c0_6, %c0_7, %c0_8] : memref<1x96x16xf32, #tpu.memory_space<vmem>>, vector<1x96x16xf32>
    %8 = vector.shape_cast %7 : vector<1x96x16xf32> to vector<96x16xf32>
    %9 = vector.shape_cast %6 : vector<96x16xf32> to vector<1x96x16xf32>
    tpu.vector_store %arg5[%c0_6, %c0_7, %c0_8], %9 {strides = array<i32>} : memref<1x96x16xf32, #tpu.memory_space<vmem>>, vector<1x96x16xf32>,
    return
  }
  func.func @transform_0(%arg0: i32, %arg1: i32) -> (i32, i32, i32) {
    %c0_i32 = arith.constant 0 : i32
    %c0_i32_0 = arith.constant 0 : i32
    return %arg0, %c0_i32, %arg1 : i32, i32, i32
  }
  func.func @transform_1(%arg0: i32, %arg1: i32) -> (i32, i32) {
    %c0_i32 = arith.constant 0 : i32
    %c0_i32_0 = arith.constant 0 : i32
    %c0_i32_1 = arith.constant 0 : i32
    return %c0_i32, %c0_i32_0 : i32, i32
  }
  func.func @transform_2(%arg0: i32, %arg1: i32) -> (i32, i32) {
    %c0_i32 = arith.constant 0 : i32
    %c0_i32_0 = arith.constant 0 : i32
    %c0_i32_1 = arith.constant 0 : i32
    return %c0_i32, %c0_i32_0 : i32, i32
  }
  func.func @transform_3(%arg0: i32, %arg1: i32) -> (i32, i32, i32) {
    %c0_i32 = arith.constant 0 : i32
    %c0_i32_0 = arith.constant 0 : i32
    return %arg0, %c0_i32, %arg1 : i32, i32, i32
  }
}

</mosaic_0001>

<bundles_post_ra>
// kernel: tpu_custom_call.1
= control target key start
LH: loop header
LB: loop body
LE: loop exit
PB: predicated region body
PF: predicated region fallthrough
CT: control target
= control target key end

     0   :  { %s677_s12 = smov 0   ;;  %s679_s13 = smov 0   ;;  %s800_s0 = inlined_call_operand.vmem [shape: bf16[2,48,16], index: 0, kind: input, shape index: {}]   ;;  %s801_s1 = inlined_call_operand.vmem [shape: bf16[96,48], index: 1, kind: input, shape index: {}]   ;;  %s802_s2 = inlined_call_operand.vmem [shape: f32[96,1], index: 2, kind: input, shape index: {}]   ;;  %s803_s3 = inlined_call_operand.vmem [shape: f32[2,96,16], index: 3, kind: output, shape index: {}]  }
   0x1   :  { %s681_s14 = smov 0  }
   0x2 LB: > { %s25_s15 = sadd.s32 1, %s650_s13  ;;  %p541_p0 = scmp.ge.s32.totalorder %s654_s14, 1  ;;  %s654_s14 = sphi %s681_s14, %s13_s14   ;;  %s650_s13 = sphi %s679_s13, %s805_s13   ;;  %s646_s12 = sphi %s677_s12, %s804_s12  }
   0x3   : > { %p27_p1 = scmp.ge.s32.totalorder %s25_s15, 2  ;;  %p156_p2 = scmp.lt.s32.totalorder %s654_s14, 3 }
   0x5   : > { %s807_s15 = smov (%p27_p1, %s25_s15), 0  ;;  %p157_p3 = pnand %p541_p0, %p156_p2 }
   0x6   : > { %p186_p4 = scmp.lt.s32.totalorder (!%p157_p3), %s646_s12, 1 }
   0x7   : > { %160 = sbr.rel (%p157_p3) target bundleno = 239 (0xef), region = 32 }
   0xc   : > { %v626_v0 = vld [vmem:[%s801_s1] sm:$0xff]   ;;  %vm341_vm0 = vcmask 392192   ;;  %v627_v1 = vld [vmem:[%s801_s1 + $0x10] sm:$0xff]   ;;  %s809_s12 = smov (!%p186_p4, %s646_s12), 1  ;;  %v656_v2 = vmov 0   ;;  %v218_v7 = vld [vmem:[%s802_s2 + $0x18] sm:$0xff] }
   0xd   : > { %576 = vmatprep.mubr.msk.bf16.mxu0 %vm341_vm0, %v626_v0  ;;  %580 = vmatprep.mubr.msk.bf16.mxu1 %vm341_vm0, %v627_v1  ;;  %s594_s20 = smul.u32 24, %s809_s12  ;;  %v217_v3 = vld [vmem:[%s802_s2 + $0x10] sm:$0xff]  ;;  %v215_v4 = vld [vmem:[%s802_s2] sm:$0xff]  ;;  %v216_v8 = vld [vmem:[%s802_s2 + $0x8] sm:$0xff]  ;;  %vm441_vm1 = vcmask 130048  }
   0xe   : > { %622 = vset.pattern.permute.xlu1 %v656_v2  ;;  %621 = vset.pattern.permute.xlu0 %v656_v2  ;;  %v220_v10 = vld [vmem:[%s802_s2 + $0x28] sm:$0xff]  ;;  %v219_v11 = vld [vmem:[%s802_s2 + $0x20] sm:$0xff]  ;;  %v629_v13 = vld [vmem:[%s801_s1 + $0x18] sm:$0xff]   ;;  %s595_s6 = smul.u32 96, %s809_s12 }
   0xf   : > { %s193_s23 = scalar_lea.vmem %s800_s0, %s594_s20  ;;  %245 = vperm.xlu1 %622, %v217_v3   ;;  %235 = vperm.xlu0 %621, %v215_v4   ;;  %v628_v12 = vld [vmem:[%s801_s1 + $0x8] sm:$0xff]   ;;  %v222_v14 = vld [vmem:[%s802_s2 + $0x38] sm:$0xff]  ;;  %v221_v15 = vld [vmem:[%s802_s2 + $0x30] sm:$0xff] }
  0x10   : > { %v623_v5 = vld [vmem:[%s193_s23 + $0x10] sm:$0xff]   ;;  %v624_v6 = vld [vmem:[%s193_s23 + $0x8] sm:$0xff]   ;;  %v625_v9 = vld [vmem:[%s193_s23] sm:$0xff]   ;;  %s765_s9 = scalar_lea.vmem %s803_s3, %s595_s6 }
  0x11   : > { %570 = vmatprep.subr.bf16.mxu0 %v623_v5  ;;  %588 = vmatprep.subr.bf16.mxu1 %v623_v5  ;;  %v630_v16 = vld [vmem:[%s801_s1 + $0x20] sm:$0xff]   ;;  %v224_v17 = vld [vmem:[%s802_s2 + $0x48] sm:$0xff]  ;;  %v226_v20 = vld [vmem:[%s802_s2 + $0x58] sm:$0xff] }
  0x12   : > { %571 = vmatpush3.bf16.msra.mxu0 %v623_v5  ;;  %591 = vmatpush3.bf16.msra.mxu1 %v623_v5  ;;  %v223_v18 = vld [vmem:[%s802_s2 + $0x40] sm:$0xff]  ;;  %v631_v19 = vld [vmem:[%s801_s1 + $0x28] sm:$0xff]   ;;  %v225_v21 = vld [vmem:[%s802_s2 + $0x50] sm:$0xff] }
  0x13   : > { %572 = vmatprep.subr.bf16.mxu0 %v624_v6  ;;  %589 = vmatprep.subr.bf16.mxu1 %v624_v6 }
  0x14   : > { %250 = vperm.xlu1 %622, %v218_v7   ;;  %240 = vperm.xlu0 %621, %v216_v8  }
  0x16   : > { %573 = vmatpush3.bf16.msra.mxu0 %v624_v6  ;;  %592 = vmatpush3.bf16.msra.mxu1 %v624_v6 }
  0x17   : > { %574 = vmatprep.subr.bf16.mxu0 %v625_v9  ;;  %590 = vmatprep.subr.bf16.mxu1 %v625_v9 }
  0x18   : > { %260 = vperm.xlu1 %622, %v220_v10   ;;  %255 = vperm.xlu0 %621, %v219_v11  }
  0x1a   : > { %575 = vmatpush3.bf16.msra.mxu0 %v625_v9  ;;  %593 = vmatpush3.bf16.msra.mxu1 %v625_v9 }
  0x1c   : > { %270 = vperm.xlu1 %622, %v222_v14   ;;  %265 = vperm.xlu0 %621, %v221_v15  }
  0x1d   : > { %577 = vmatmul.mubr.msk.bf16.vlgmr.msra.gmra.mxu0 %vm341_vm0, %v628_v12  ;;  %581 = vmatmul.mubr.msk.bf16.vlgmr.msra.gmra.mxu1 %vm341_vm0, %v629_v13 }
  0x1e   : > { %584 = vmatprep.mubr.msk.bf16.mxu1 %vm341_vm0, %v630_v16 }
  0x20   : > { %280 = vperm.xlu1 %622, %v224_v17   ;;  %275 = vperm.xlu0 %621, %v223_v18  }
  0x24   : > { %290 = vperm.xlu1 %622, %v226_v20   ;;  %285 = vperm.xlu0 %621, %v225_v21  }
  0x25   : > { %585 = vmatmul.mubr.msk.bf16.gmra.mxu1 %vm341_vm0, %v631_v19 }
  0x8a   : > { %v236_v22 = vpop.permute.xlu0 %235  ;;  %v246_v23 = vpop.permute.xlu1 %245 }
  0x8f   : > { %v241_v24 = vpop.permute.xlu0 %240  ;;  %v251_v25 = vpop.permute.xlu1 %250 }
  0x93   : > { %v256_v26 = vpop.permute.xlu0 %255  ;;  %v261_v27 = vpop.permute.xlu1 %260 }
  0x97   : > { %v266_v28 = vpop.permute.xlu0 %265  ;;  %v271_v29 = vpop.permute.xlu1 %270 }
  0x9b   : > { %v276_v32 = vpop.permute.xlu0 %275  ;;  %v281_v41 = vpop.permute.xlu1 %280 }
  0x9f   : > { %v286_v48 = vpop.permute.xlu0 %285  ;;  %v291_v53 = vpop.permute.xlu1 %290 }
  0xdd   : > { %v578_v30 = vpop.f32.mrf.mxu0  ;;  %v582_v31 = vpop.f32.mrf.mxu1 }
  0xde   : > { %v403_v33 = vadd.f32 %v578_v30, %v246_v23  ;;  %v419_v34 = vadd.f32 %v582_v31, %v266_v28 }
  0xdf   : > { %v394_v35 = vpop.f32.mrf.mxu0  ;;  %v410_v36 = vpop.f32.mrf.mxu1 }
  0xe0   : > { %444 = vst.msk [vmem:[%s765_s9 + $0x10] sm:$0xff] %vm441_vm1, %v403_v33  ;;  %448 = vst.msk [vmem:[%s765_s9 + $0x30] sm:$0xff] %vm441_vm1, %v419_v34  ;;  %v395_v37 = vadd.f32 %v394_v35, %v236_v22  ;;  %v411_v38 = vadd.f32 %v410_v36, %v256_v26 }
  0xe1   : > { %v579_v39 = vpop.f32.mrf.mxu0  ;;  %v583_v40 = vpop.f32.mrf.mxu1 }
  0xe2   : > { %442 = vst.msk [vmem:[%s765_s9] sm:$0xff] %vm441_vm1, %v395_v37  ;;  %446 = vst.msk [vmem:[%s765_s9 + $0x20] sm:$0xff] %vm441_vm1, %v411_v38  ;;  %v406_v42 = vadd.f32 %v579_v39, %v251_v25  ;;  %v422_v43 = vadd.f32 %v583_v40, %v271_v29 }
  0xe3   : > { %v397_v44 = vpop.f32.mrf.mxu0  ;;  %v413_v45 = vpop.f32.mrf.mxu1 }
  0xe4   : > { %445 = vst.msk [vmem:[%s765_s9 + $0x18] sm:$0xff] %vm441_vm1, %v406_v42  ;;  %449 = vst.msk [vmem:[%s765_s9 + $0x38] sm:$0xff] %vm441_vm1, %v422_v43  ;;  %v398_v46 = vadd.f32 %v397_v44, %v241_v24  ;;  %v414_v47 = vadd.f32 %v413_v45, %v261_v27 }
  0xe5   : > { %v586_v49 = vpop.f32.mrf.mxu1 }
  0xe6   : > { %443 = vst.msk [vmem:[%s765_s9 + $0x8] sm:$0xff] %vm441_vm1, %v398_v46  ;;  %447 = vst.msk [vmem:[%s765_s9 + $0x28] sm:$0xff] %vm441_vm1, %v414_v47  ;;  %v435_v50 = vadd.f32 %v586_v49, %v286_v48 }
  0xe7   : > { %v426_v51 = vpop.f32.mrf.mxu1 }
  0xe8   : > { %452 = vst.msk [vmem:[%s765_s9 + $0x50] sm:$0xff] %vm441_vm1, %v435_v50  ;;  %v427_v52 = vadd.f32 %v426_v51, %v276_v32 }
  0xe9   : > { %v587_v54 = vpop.f32.mrf.mxu1 }
  0xea   : > { %450 = vst.msk [vmem:[%s765_s9 + $0x40] sm:$0xff] %vm441_vm1, %v427_v52  ;;  %v438_v55 = vadd.f32 %v587_v54, %v291_v53 }
  0xeb   : > { %v429_v56 = vpop.f32.mrf.mxu1 }
  0xec   : > { %453 = vst.msk [vmem:[%s765_s9 + $0x58] sm:$0xff] %vm441_vm1, %v438_v55  ;;  %v430_v57 = vadd.f32 %v429_v56, %v281_v41 }
  0xee   : > { %451 = vst.msk [vmem:[%s765_s9 + $0x48] sm:$0xff] %vm441_vm1, %v430_v57 }
  0xef PF: > { %s13_s14 = sadd.s32 1, %s654_s14   ;;  %s804_s12 = smov %s650_s13 }
  0xf0   : > { %p10_p5 = scmp.ge.s32.totalorder %s13_s14, 4   ;;  %s805_s13 = smov %s807_s15 }
  0xf2   :  { %12 = sbr.rel (!%p10_p5) target bundleno = 2 (0x2), region = 62 }

</bundles_post_ra>
